<compile_context>
chip_gen: v6e
topology: v6e:2x2x1
jax: 0.10.0
libtpu: 0.0.40
codegen_flags: <defaults>
</compile_context>

<pallas_src>
import functools
from types import SimpleNamespace

import numpy as np
import jax
import jax.numpy as jnp
from jax.experimental import pallas as pl
from jax.experimental.pallas import tpu as pltpu


# --------------------------------------------------------------------------- #
# Kernel
# --------------------------------------------------------------------------- #
def _fused_kernel(*refs, has_mu_cluster, z_capacity, n_blocks, block_rows,
                  rows_total, needs_mask, n_par):
    if has_mu_cluster:
        (recs_ref, inp_ref, mus_ref, lv_ref, mucl_ref, reprs_ref, conc_ref,
         selw_ref, preds_ref, oh_ref, lw_ref, out_ref, acc_ref) = refs
    else:
        (recs_ref, inp_ref, lv_ref, reprs_ref, conc_ref,
         selw_ref, preds_ref, oh_ref, lw_ref, out_ref, acc_ref) = refs
        mus_ref = mucl_ref = None

    f32 = jnp.float32
    c = pl.program_id(0)
    i = pl.program_id(1)
    last = pl.num_programs(1) - 1

    @pl.when(i == 0)
    def _init():
        acc_ref[...] = jnp.zeros_like(acc_ref)

    # ---- streaming SSE accumulate (HBM-bound hot loop, native-dtype tiles) ----
    def _accum(d):
        dd = d * d
        if block_rows % 8 == 0:
            # per-vreg partial sums -> (8, lane) accumulator; pure VPU adds,
            # no cross-lane/XLU reduce in the loop-carried chain.
            acc_ref[...] += jnp.sum(dd.reshape(-1, 8, dd.shape[-1]), axis=0)
        else:
            acc_ref[...] += jnp.sum(dd, axis=0, keepdims=True)

    row0 = (c * n_blocks + i) * block_rows            # logical (unclamped) start row

    if not needs_mask:                                 # static: tiles divide exactly
        _accum(recs_ref[...].astype(f32) - inp_ref[...].astype(f32))
    else:
        is_full = row0 + block_rows <= rows_total

        @pl.when(is_full)
        def _full_block():
            _accum(recs_ref[...].astype(f32) - inp_ref[...].astype(f32))

        @pl.when(jnp.logical_not(is_full))
        def _edge_block():                             # boundary / over-covered block
            d = recs_ref[...].astype(f32) - inp_ref[...].astype(f32)
            r = jax.lax.broadcasted_iota(jnp.int32, d.shape, 0) + row0
            _accum(jnp.where(r < rows_total, d, 0.0))

    # ---- finalize: small loss heads + lane-dense (8,128) output write ----
    def _write_out(vals):
        sub = jax.lax.broadcasted_iota(jnp.int32, (8, 128), 0)
        v = jnp.zeros((8, 128), f32)
        for k, s in enumerate(vals):
            v = jnp.where(sub == k, s, v)
        out_ref[0] = v

    def _heads_and_write():
        sse = jnp.sum(acc_ref[...])

        # Burgess KLD
        lv = lv_ref[...].astype(f32)
        if has_mu_cluster:                             # static branch
            mu = mus_ref[...].astype(f32) - mucl_ref[...].astype(f32)
            term = 1.0 + lv - mu * mu - jnp.exp(lv)
        else:
            term = 1.0 + lv - jnp.exp(lv)
        kld_per = -0.5 * jnp.sum(term, axis=1, keepdims=True) - z_capacity
        kld = jnp.mean(jnp.abs(kld_per))

        # concept BCE numerator: BCE(sigmoid(x), y) * (sel * weight), summed
        x = reprs_ref[...].astype(f32)
        y = conc_ref[...].astype(f32)
        bce = jnp.maximum(x, 0.0) - x * y + jnp.log(1.0 + jnp.exp(-jnp.abs(x)))
        c_numer = jnp.sum(bce * selw_ref[...].astype(f32))

        # weighted label cross-entropy (PyTorch weighted-mean semantics)
        p = preds_ref[...].astype(f32)
        oh = oh_ref[...].astype(f32)
        m = jnp.max(p, axis=1, keepdims=True)
        lse = m + jnp.log(jnp.sum(jnp.exp(p - m), axis=1, keepdims=True))
        nll = lse - jnp.sum(oh * p, axis=1, keepdims=True)
        w_i = jnp.sum(oh * lw_ref[...].astype(f32), axis=1, keepdims=True)
        pred_loss = jnp.sum(w_i * nll) / jnp.sum(w_i)

        _write_out([sse, kld, c_numer, pred_loss])

    if n_par == 1:
        @pl.when(i == last)
        def _finalize():
            _heads_and_write()
    else:
        @pl.when((i == last) & (c == 0))
        def _finalize_main():
            _heads_and_write()

        @pl.when((i == last) & (c > 0))
        def _finalize_aux():                           # other core: SSE partial only
            _write_out([jnp.sum(acc_ref[...])])


# --------------------------------------------------------------------------- #
# Per-generation tiling plan
# --------------------------------------------------------------------------- #
def _chip_plan():
    """Returns (per-image-buffer tile bytes, vmem_limit_bytes, preferred core split)."""
    kind = ""
    try:
        kind = jax.devices()[0].device_kind.lower()
    except Exception:
        pass
    if "7" in kind:                    # v7x: 2 TCs, 64 MiB VMEM, ~3.2 TB/s HBM
        return 3 << 20, 48 << 20, 2
    if "v6" in kind or "6e" in kind:   # v6e: 1 TC, 128 MiB VMEM
        return 4 << 20, 80 << 20, 1
    if "v5p" in kind or "v4" in kind:  # megacore (2-TC) chips, 128 MiB VMEM
        return 4 << 20, 80 << 20, 2
    if "v5" in kind:                   # v5e: 1 TC, small scoped default (128 MiB phys)
        return 3 << 20, 64 << 20, 1
    return 2 << 20, 48 << 20, 1        # unknown: conservative


def _plan_recon_tiles(n_elems, itemsize, buf_bytes, n_par_pref):
    """Unpadded lane-dense tiling plan for the streamed MSE (no jnp.pad anywhere)."""
    lane = 128
    for cand in (512, 256, 128):
        if n_elems % cand == 0:
            lane = cand
            break
    rows = n_elems // lane
    main_elems = rows * lane
    if rows == 0:          # tiny input: whole MSE handled by the wrapper tail op
        return dict(lane=128, rows=8, main_elems=0, block_rows=8, blocks_total=1,
                    n_blocks=1, n_par=1, needs_mask=False, stub=True)
    budget_rows = max(8, (buf_bytes // (lane * itemsize)) // 8 * 8)
    if rows <= budget_rows:
        block_rows, blocks_total, n_par = rows, 1, 1
    else:
        block_rows = budget_rows
        blocks_total = -(-rows // block_rows)
        n_par = n_par_pref if blocks_total >= 2 else 1
    n_blocks = -(-blocks_total // n_par)
    needs_mask = (n_par * n_blocks * block_rows != rows)
    return dict(lane=lane, rows=rows, main_elems=main_elems, block_rows=block_rows,
                blocks_total=blocks_total, n_blocks=n_blocks, n_par=n_par,
                needs_mask=needs_mask, stub=False)


# --------------------------------------------------------------------------- #
# pallas_call wrapper
# --------------------------------------------------------------------------- #
def _run_fused(recs2d, inp2d, mus, logvars, mu_cluster, reprs, concepts,
               selw, preds, onehot, lwrow, *, z_capacity, plan, vmem_limit,
               flops, bytes_accessed, transcendentals):
    has_mu = mu_cluster is not None
    lane, block_rows = plan['lane'], plan['block_rows']
    rows, blocks_total = plan['rows'], plan['blocks_total']
    n_blocks, n_par = plan['n_blocks'], plan['n_par']

    kern = functools.partial(
        _fused_kernel, has_mu_cluster=has_mu, z_capacity=float(z_capacity),
        n_blocks=n_blocks, block_rows=block_rows, rows_total=rows,
        needs_mask=plan['needs_mask'], n_par=n_par)

    def img_map(c, i):
        # Clamp so an over-covering block never starts past the array; its
        # (duplicated) contribution is masked to zero inside the kernel.
        return (jnp.minimum(c * n_blocks + i, blocks_total - 1), 0)

    def const_map(c, i):
        return (0, 0)

    def full_spec(arr):                  # whole small array, loaded once
        return pl.BlockSpec(arr.shape, const_map)

    img_spec = pl.BlockSpec((block_rows, lane), img_map)

    in_specs = [img_spec, img_spec]
    operands = [recs2d, inp2d]
    if has_mu:
        in_specs += [full_spec(mus), full_spec(logvars), full_spec(mu_cluster)]
        operands += [mus, logvars, mu_cluster]
    else:
        in_specs += [full_spec(logvars)]
        operands += [logvars]
    for a in (reprs, concepts, selw, preds, onehot, lwrow):
        in_specs.append(full_spec(a))
        operands.append(a)

    acc_rows = 8 if block_rows % 8 == 0 else 1

    return pl.pallas_call(
        kern,
        out_shape=jax.ShapeDtypeStruct((n_par, 8, 128), jnp.float32),
        grid_spec=pltpu.PrefetchScalarGridSpec(
            num_scalar_prefetch=0,
            grid=(n_par, n_blocks),
            in_specs=in_specs,
            out_specs=pl.BlockSpec((1, 8, 128), lambda c, i: (c, 0, 0)),
            scratch_shapes=[pltpu.VMEM((acc_rows, lane), jnp.float32)]),
        compiler_params=pltpu.CompilerParams(
            dimension_semantics=("parallel", "arbitrary"),
            vmem_limit_bytes=int(vmem_limit)),
        cost_estimate=pl.CostEstimate(flops=int(flops),
                                      transcendentals=int(transcendentals),
                                      bytes_accessed=int(bytes_accessed)),
    )(*operands)


def beta_glancenet_loss(out_dict, args, int_C=6, tile_bytes=None):
    """JAX/Pallas port of betaGlanceNet_Loss.forward(out_dict, args)."""
    recs = out_dict['RECS']
    inputs = out_dict['INPUTS']
    mus = out_dict['MUS']
    logvars = out_dict['LOGVARS']
    mu_cluster = out_dict.get('mu_cluster', None)

    # -- VAE_Concept_Match glue: column selection (mask, then first int_C cols) --
    concepts = out_dict['CONCEPTS'].astype(jnp.float32)              # (B, nC)
    n_c = concepts.shape[-1]
    model = getattr(args, 'model', '')
    reprs = (out_dict['LOGITS'] if model == 'betaplusglancenet'
             else out_dict['LATENTS'])[:, :n_c]
    mask = concepts[0, :] != -1
    cw = out_dict.get('CE_WEIGHT', None)
    cweights = (jnp.ones((n_c,), jnp.float32) if cw is None
                else cw.astype(jnp.float32))
    csum = jnp.cumsum(mask.astype(jnp.int32))
    sel = (mask & (csum <= int_C)).astype(jnp.float32)
    n_sel = jnp.sum(sel)
    selw = (sel * cweights).reshape(1, n_c)          # folded select + weight operand

    # -- single_label_loss glue: one-hot labels, class weights --
    preds = out_dict['PREDS']
    ys = out_dict['LABELS'].astype(jnp.int32).reshape(-1)
    k = preds.shape[1]
    lw = out_dict.get('CE_weight_labels', None)
    lwrow = (jnp.ones((k,), jnp.float32) if lw is None
             else lw.astype(jnp.float32)).reshape(1, k)
    onehot = jax.nn.one_hot(ys, k, dtype=jnp.float32)

    # -- lane-dense, UNPADDED layout for the mem-bound recon term (native dtype) --
    batch = recs.shape[0]
    n_elems = int(np.prod(recs.shape))
    itemsize = int(max(recs.dtype.itemsize, inputs.dtype.itemsize))
    buf_bytes, vmem_limit, n_par_pref = _chip_plan()
    if tile_bytes is not None:
        buf_bytes = int(tile_bytes)
    plan = _plan_recon_tiles(n_elems, itemsize, buf_bytes, n_par_pref)

    flat_r, flat_i = recs.reshape(-1), inputs.reshape(-1)
    main = plan['main_elems']
    if plan['stub']:
        recs2d = jnp.zeros((plan['rows'], plan['lane']), recs.dtype)
        inp2d = jnp.zeros((plan['rows'], plan['lane']), inputs.dtype)
    elif main == n_elems:
        recs2d = flat_r.reshape(plan['rows'], plan['lane'])      # free contiguous view
        inp2d = flat_i.reshape(plan['rows'], plan['lane'])
    else:
        # Rare fallback (n_elems not a multiple of 128): one prefix-slice copy.
        recs2d = jax.lax.slice(flat_r, (0,), (main,)).reshape(plan['rows'], plan['lane'])
        inp2d = jax.lax.slice(flat_i, (0,), (main,)).reshape(plan['rows'], plan['lane'])
    if main < n_elems:                               # <1-lane tail: tiny XLA op
        dt = flat_r[main:].astype(jnp.float32) - flat_i[main:].astype(jnp.float32)
        tail_sse = jnp.sum(dt * dt)
    else:
        tail_sse = jnp.float32(0.0)

    tile_b = plan['block_rows'] * plan['lane'] * itemsize
    vmem_limit = max(vmem_limit, 6 * tile_b + (8 << 20))  # 4 dbl-buf tiles + f32 temps

    small = [mus, logvars, reprs, concepts, selw, preds, onehot, lwrow]
    if mu_cluster is not None:
        small.append(mu_cluster)
    small_bytes = sum(int(np.prod(a.shape)) * a.dtype.itemsize for a in small)
    bytes_accessed = (recs2d.size * recs2d.dtype.itemsize
                      + inp2d.size * inp2d.dtype.itemsize
                      + small_bytes + plan['n_par'] * 8 * 128 * 4)
    flops = 3 * n_elems + 20 * int(mus.size + reprs.size + preds.size)
    transcendentals = int(mus.size + 2 * reprs.size + 2 * preds.size)

    out = _run_fused(recs2d, inp2d, mus, logvars, mu_cluster, reprs, concepts,
                     selw, preds, onehot, lwrow,
                     z_capacity=args.z_capacity, plan=plan, vmem_limit=vmem_limit,
                     flops=flops, bytes_accessed=bytes_accessed,
                     transcendentals=transcendentals)

    recon = (jnp.sum(out[:, 0, 0]) + tail_sse) / float(n_elems)
    kld = out[0, 1, 0]
    c_loss = jnp.where(n_sel > 0,
                       out[0, 2, 0] / (batch * jnp.maximum(n_sel, 1.0)),
                       jnp.float32(0.0))
    pred_loss = out[0, 3, 0]

    loss1 = recon + args.beta * kld                           # betaVAE_ELBO total
    total = args.w_label * pred_loss + args.w_rec * loss1 + args.w_c * c_loss

    # One host transfer for the logging dict (instead of four blocking .item()s).
    parts = np.asarray(jax.device_get(jnp.stack([recon, kld, c_loss, pred_loss])))
    losses = {'recon-loss': float(parts[0]), 'kld': float(parts[1]),
              'c-loss': float(parts[2]), 'pred-loss': float(parts[3])}
    return total, losses


# --------------------------------------------------------------------------- #
# Pure-JAX reference (follows the PyTorch code literally)
# --------------------------------------------------------------------------- #
def _reference(out_dict, args, int_C=6):
    recs, inputs = out_dict['RECS'], out_dict['INPUTS']
    recon = jnp.mean((recs - inputs) ** 2)
    mus, lv = out_dict['MUS'], out_dict['LOGVARS']
    mu_c = out_dict.get('mu_cluster', None)
    if mu_c is not None:
        mu = mus - mu_c
        kld = jnp.mean(jnp.abs(-0.5 * jnp.sum(1 + lv - mu ** 2 - jnp.exp(lv), axis=1)
                               - args.z_capacity))
    else:
        kld = jnp.mean(jnp.abs(-0.5 * jnp.sum(1 + lv - jnp.exp(lv), axis=1)
                               - args.z_capacity))
    concepts = out_dict['CONCEPTS'].astype(jnp.float32)
    reprs = out_dict['LATENTS'][:, :concepts.shape[-1]]
    mask = np.asarray(concepts[0, :] != -1)
    idx = np.nonzero(mask)[0][:int_C]
    if idx.size > 0:
        x, y = reprs[:, idx], concepts[:, idx]
        p = jax.nn.sigmoid(x)
        c_loss = jnp.mean(-(y * jnp.log(p) + (1 - y) * jnp.log(1 - p)))
    else:
        c_loss = jnp.float32(0.0)
    preds, ys = out_dict['PREDS'], out_dict['LABELS'].astype(jnp.int32).reshape(-1)
    logp = jax.nn.log_softmax(preds, axis=1)
    pred_loss = jnp.mean(-logp[jnp.arange(preds.shape[0]), ys])
    return args.w_label * pred_loss + args.w_rec * (recon + args.beta * kld) + args.w_c * c_loss


if __name__ == "__main__":
    args = SimpleNamespace(model='betaglancenet', z_capacity=0.5, beta=4.0,
                           w_label=1.0, w_rec=1.0, w_c=2.0)

    def make_inputs(key, B, C, H, W, Z=32, nC=8, K=2, with_mu=True):
        ks = jax.random.split(key, 8)
        recs = jax.random.normal(ks[0], (B, C, H, W), jnp.float32)
        inputs = jax.random.normal(ks[1], (B, C, H, W), jnp.float32)
        mus = jax.random.normal(ks[2], (B, Z), jnp.float32)
        logvars = 0.1 * jax.random.normal(ks[3], (B, Z), jnp.float32)
        mu_cluster = (0.5 * jax.random.normal(ks[4], (B, Z), jnp.float32)
                      if with_mu else None)
        latents = jax.random.normal(ks[5], (B, Z), jnp.float32)
        concepts = jax.random.bernoulli(ks[6], 0.5, (B, nC)).astype(jnp.float32)
        concepts = concepts.at[:, 5].set(-1.0)          # one masked-out concept column
        preds = jax.random.normal(ks[7], (B, K), jnp.float32)
        labels = jnp.arange(B, dtype=jnp.int32) % K
        return {'RECS': recs, 'INPUTS': inputs, 'MUS': mus, 'LOGVARS': logvars,
                'mu_cluster': mu_cluster, 'LATENTS': latents, 'CONCEPTS': concepts,
                'PREDS': preds, 'LABELS': labels,
                'CE_WEIGHT': None, 'CE_weight_labels': None}

    key = jax.random.PRNGKey(0)
    k1, k2, k3 = jax.random.split(key, 3)

    # 1) single-block path, with mu_cluster
    od1 = make_inputs(k1, 2, 4, 16, 16, with_mu=True)
    t1, losses1 = beta_glancenet_loss(od1, args, int_C=6)
    t1 = jax.block_until_ready(t1)
    r1 = jax.block_until_ready(_reference(od1, args, int_C=6))
    np.testing.assert_allclose(np.asarray(t1), np.asarray(r1), rtol=1e-3, atol=1e-4)

    # 2) static no-mu_cluster kernel variant
    od2 = make_inputs(k2, 2, 4, 16, 16, with_mu=False)
    t2, _ = beta_glancenet_loss(od2, args, int_C=6)
    t2 = jax.block_until_ready(t2)
    r2 = jax.block_until_ready(_reference(od2, args, int_C=6))
    np.testing.assert_allclose(np.asarray(t2), np.asarray(r2), rtol=1e-3, atol=1e-4)

    # 3) multi-block path with a partial (masked) boundary block and a <128-elem tail
    od3 = make_inputs(k3, 2, 3, 17, 17, with_mu=True)
    t3, _ = beta_glancenet_loss(od3, args, int_C=6, tile_bytes=4096)
    t3 = jax.block_until_ready(t3)
    r3 = jax.block_until_ready(_reference(od3, args, int_C=6))
    np.testing.assert_allclose(np.asarray(t3), np.asarray(r3), rtol=1e-3, atol=1e-4)

    print("KERNEL_OK")
</pallas_src>

<mosaic_0001>
module attributes {stable_mosaic.version = 11 : i64} {
  func.func @_fused_kernel(%arg0: i32, %arg1: i32, %arg2: memref<4x512xf32, #tpu.memory_space<vmem>>, %arg3: memref<4x512xf32, #tpu.memory_space<vmem>>, %arg4: memref<2x32xf32, #tpu.memory_space<vmem>>, %arg5: memref<2x32xf32, #tpu.memory_space<vmem>>, %arg6: memref<2x32xf32, #tpu.memory_space<vmem>>, %arg7: memref<2x8xf32, #tpu.memory_space<vmem>>, %arg8: memref<2x8xf32, #tpu.memory_space<vmem>>, %arg9: memref<1x8xf32, #tpu.memory_space<vmem>>, %arg10: memref<2x2xf32, #tpu.memory_space<vmem>>, %arg11: memref<2x2xf32, #tpu.memory_space<vmem>>, %arg12: memref<1x2xf32, #tpu.memory_space<vmem>>, %arg13: memref<1x8x128xf32, #tpu.memory_space<vmem>>, %arg14: memref<1x512xf32, #tpu.memory_space<vmem>>) attributes {dimension_semantics = [#tpu.dimension_semantics<parallel>, #tpu.dimension_semantics<arbitrary>], iteration_bounds = array<i64: 1, 1>, scalar_prefetch = 0 : i64, scratch_operands = 1 : i64, tpu.core_type = #tpu.core_type<tc>, window_params = [{transform_indices = @transform_0, window_bounds = array<i64: 4, 512>}, {transform_indices = @transform_1, window_bounds = array<i64: 4, 512>}, {pipeline_mode = #tpu.pipeline_mode<synchronous>, transform_indices = @transform_2, window_bounds = array<i64: 2, 32>}, {pipeline_mode = #tpu.pipeline_mode<synchronous>, transform_indices = @transform_3, window_bounds = array<i64: 2, 32>}, {pipeline_mode = #tpu.pipeline_mode<synchronous>, transform_indices = @transform_4, window_bounds = array<i64: 2, 32>}, {pipeline_mode = #tpu.pipeline_mode<synchronous>, transform_indices = @transform_5, window_bounds = array<i64: 2, 8>}, {pipeline_mode = #tpu.pipeline_mode<synchronous>, transform_indices = @transform_6, window_bounds = array<i64: 2, 8>}, {pipeline_mode = #tpu.pipeline_mode<synchronous>, transform_indices = @transform_7, window_bounds = array<i64: 1, 8>}, {pipeline_mode = #tpu.pipeline_mode<synchronous>, transform_indices = @transform_8, window_bounds = array<i64: 2, 2>}, {pipeline_mode = #tpu.pipeline_mode<synchronous>, transform_indices = @transform_9, window_bounds = array<i64: 2, 2>}, {pipeline_mode = #tpu.pipeline_mode<synchronous>, transform_indices = @transform_10, window_bounds = array<i64: 1, 2>}, {transform_indices = @transform_11, window_bounds = array<i64: 1, 8, 128>}]} {
    %c0_i32 = arith.constant 0 : i32
    %0 = arith.cmpi eq, %arg1, %c0_i32 : i32
    %1 = arith.extui %0 : i1 to i32
    %c0_i32_0 = arith.constant 0 : i32
    %2 = arith.cmpi ne, %1, %c0_i32_0 : i32
    scf.if %2 {
      %cst_10 = arith.constant 0.000000e+00 : f32
      %15 = vector.broadcast %cst_10 : f32 to vector<1x512xf32>
      %c0_11 = arith.constant 0 : index
      %c0_12 = arith.constant 0 : index
      %16 = vector.load %arg14[%c0_11, %c0_12] : memref<1x512xf32, #tpu.memory_space<vmem>>, vector<1x512xf32>
      tpu.vector_store %arg14[%c0_11, %c0_12], %15 {strides = array<i32>} : memref<1x512xf32, #tpu.memory_space<vmem>>, vector<1x512xf32>,
    } else {
    }
    %c0 = arith.constant 0 : index
    %c0_1 = arith.constant 0 : index
    %3 = vector.load %arg2[%c0, %c0_1] : memref<4x512xf32, #tpu.memory_space<vmem>>, vector<4x512xf32>
    %c0_2 = arith.constant 0 : index
    %c0_3 = arith.constant 0 : index
    %4 = vector.load %arg3[%c0_2, %c0_3] : memref<4x512xf32, #tpu.memory_space<vmem>>, vector<4x512xf32>
    %5 = arith.subf %3, %4 : vector<4x512xf32>
    %6 = arith.mulf %5, %5 : vector<4x512xf32>
    %c0_4 = arith.constant 0 : index
    %c0_5 = arith.constant 0 : index
    %7 = vector.load %arg14[%c0_4, %c0_5] : memref<1x512xf32, #tpu.memory_space<vmem>>, vector<1x512xf32>
    %cst = arith.constant dense<0.000000e+00> : vector<512xf32>
    %8 = vector.multi_reduction <add>, %6, %cst [0] : vector<4x512xf32> to vector<512xf32>
    %9 = vector.shape_cast %8 : vector<512xf32> to vector<1x512xf32>
    %10 = arith.addf %7, %9 : vector<1x512xf32>
    %c0_6 = arith.constant 0 : index
    %c0_7 = arith.constant 0 : index
    %11 = vector.load %arg14[%c0_6, %c0_7] : memref<1x512xf32, #tpu.memory_space<vmem>>, vector<1x512xf32>
    tpu.vector_store %arg14[%c0_6, %c0_7], %10 {strides = array<i32>} : memref<1x512xf32, #tpu.memory_space<vmem>>, vector<1x512xf32>,
    %c0_i32_8 = arith.constant 0 : i32
    %12 = arith.cmpi eq, %arg1, %c0_i32_8 : i32
    %13 = arith.extui %12 : i1 to i32
    %c0_i32_9 = arith.constant 0 : i32
    %14 = arith.cmpi ne, %13, %c0_i32_9 : i32
    scf.if %14 {
      %c0_10 = arith.constant 0 : index
      %c0_11 = arith.constant 0 : index
      %15 = vector.load %arg14[%c0_10, %c0_11] : memref<1x512xf32, #tpu.memory_space<vmem>>, vector<1x512xf32>
      %16 = vector.shape_cast %15 : vector<1x512xf32> to vector<1x1x512xf32>
      %cst_12 = arith.constant dense<0.000000e+00> : vector<1xf32>
      %17 = vector.multi_reduction <add>, %16, %cst_12 [1, 2] : vector<1x1x512xf32> to vector<1xf32>
      %18 = vector.shape_cast %17 : vector<1xf32> to vector<1x1x1xf32>
      %19 = vector.extract %18[0, 0, 0] : f32 from vector<1x1x1xf32>
      %c0_13 = arith.constant 0 : index
      %c0_14 = arith.constant 0 : index
      %20 = vector.load %arg5[%c0_13, %c0_14] : memref<2x32xf32, #tpu.memory_space<vmem>>, vector<2x32xf32>
      %c0_15 = arith.constant 0 : index
      %c0_16 = arith.constant 0 : index
      %21 = vector.load %arg4[%c0_15, %c0_16] : memref<2x32xf32, #tpu.memory_space<vmem>>, vector<2x32xf32>
      %c0_17 = arith.constant 0 : index
      %c0_18 = arith.constant 0 : index
      %22 = vector.load %arg6[%c0_17, %c0_18] : memref<2x32xf32, #tpu.memory_space<vmem>>, vector<2x32xf32>
      %23 = arith.subf %21, %22 : vector<2x32xf32>
      %cst_19 = arith.constant 1.000000e+00 : f32
      %24 = vector.broadcast %cst_19 : f32 to vector<2x32xf32>
      %25 = arith.addf %24, %20 : vector<2x32xf32>
      %26 = arith.mulf %23, %23 : vector<2x32xf32>
      %27 = arith.subf %25, %26 : vector<2x32xf32>
      %28 = math.exp %20 : vector<2x32xf32>
      %29 = arith.subf %27, %28 : vector<2x32xf32>
      %cst_20 = arith.constant dense<0.000000e+00> : vector<2xf32>
      %30 = vector.multi_reduction <add>, %29, %cst_20 [1] : vector<2x32xf32> to vector<2xf32>
      %31 = vector.shape_cast %30 : vector<2xf32> to vector<2x1xf32>
      %cst_21 = arith.constant -5.000000e-01 : f32
      %32 = vector.broadcast %cst_21 : f32 to vector<2x1xf32>
      %33 = arith.mulf %32, %31 : vector<2x1xf32>
      %cst_22 = arith.constant 5.000000e-01 : f32
      %34 = vector.broadcast %cst_22 : f32 to vector<2x1xf32>
      %35 = arith.subf %33, %34 : vector<2x1xf32>
      %36 = math.absf %35 : vector<2x1xf32>
      %37 = vector.shape_cast %36 : vector<2x1xf32> to vector<1x2x1xf32>
      %cst_23 = arith.constant dense<0.000000e+00> : vector<1xf32>
      %38 = vector.multi_reduction <add>, %37, %cst_23 [1, 2] : vector<1x2x1xf32> to vector<1xf32>
      %39 = vector.shape_cast %38 : vector<1xf32> to vector<1x1x1xf32>
      %40 = vector.extract %39[0, 0, 0] : f32 from vector<1x1x1xf32>
      %cst_24 = arith.constant 2.000000e+00 : f32
      %41 = arith.divf %40, %cst_24 : f32
      %c0_25 = arith.constant 0 : index
      %c0_26 = arith.constant 0 : index
      %42 = vector.load %arg7[%c0_25, %c0_26] : memref<2x8xf32, #tpu.memory_space<vmem>>, vector<2x8xf32>
      %c0_27 = arith.constant 0 : index
      %c0_28 = arith.constant 0 : index
      %43 = vector.load %arg8[%c0_27, %c0_28] : memref<2x8xf32, #tpu.memory_space<vmem>>, vector<2x8xf32>
      %cst_29 = arith.constant 0.000000e+00 : f32
      %44 = vector.broadcast %cst_29 : f32 to vector<2x8xf32>
      %45 = arith.maximumf %42, %44 : vector<2x8xf32>
      %46 = arith.mulf %42, %43 : vector<2x8xf32>
      %47 = arith.subf %45, %46 : vector<2x8xf32>
      %48 = math.absf %42 : vector<2x8xf32>
      %cst_30 = arith.constant 0.000000e+00 : f32
      %49 = vector.broadcast %cst_30 : f32 to vector<2x8xf32>
      %50 = arith.subf %49, %48 : vector<2x8xf32>
      %51 = math.exp %50 : vector<2x8xf32>
      %cst_31 = arith.constant 1.000000e+00 : f32
      %52 = vector.broadcast %cst_31 : f32 to vector<2x8xf32>
      %53 = arith.addf %52, %51 : vector<2x8xf32>
      %54 = math.log %53 : vector<2x8xf32>
      %55 = arith.addf %47, %54 : vector<2x8xf32>
      %c0_32 = arith.constant 0 : index
      %c0_33 = arith.constant 0 : index
      %56 = vector.load %arg9[%c0_32, %c0_33] : memref<1x8xf32, #tpu.memory_space<vmem>>, vector<1x8xf32>
      %57 = vector.broadcast %56 : vector<1x8xf32> to vector<2x8xf32>
      %58 = arith.mulf %55, %57 : vector<2x8xf32>
      %59 = vector.shape_cast %58 : vector<2x8xf32> to vector<1x2x8xf32>
      %cst_34 = arith.constant dense<0.000000e+00> : vector<1xf32>
      %60 = vector.multi_reduction <add>, %59, %cst_34 [1, 2] : vector<1x2x8xf32> to vector<1xf32>
      %61 = vector.shape_cast %60 : vector<1xf32> to vector<1x1x1xf32>
      %62 = vector.extract %61[0, 0, 0] : f32 from vector<1x1x1xf32>
      %c0_35 = arith.constant 0 : index
      %c0_36 = arith.constant 0 : index
      %63 = vector.load %arg10[%c0_35, %c0_36] : memref<2x2xf32, #tpu.memory_space<vmem>>, vector<2x2xf32>
      %c0_37 = arith.constant 0 : index
      %c0_38 = arith.constant 0 : index
      %64 = vector.load %arg11[%c0_37, %c0_38] : memref<2x2xf32, #tpu.memory_space<vmem>>, vector<2x2xf32>
      %cst_39 = arith.constant dense<0xFF800000> : vector<2xf32>
      %65 = vector.multi_reduction <maximumf>, %63, %cst_39 [1] : vector<2x2xf32> to vector<2xf32>
      %66 = vector.shape_cast %65 : vector<2xf32> to vector<2x1xf32>
      %67 = vector.broadcast %66 : vector<2x1xf32> to vector<2x2xf32>
      %68 = arith.subf %63, %67 : vector<2x2xf32>
      %69 = math.exp %68 : vector<2x2xf32>
      %cst_40 = arith.constant dense<0.000000e+00> : vector<2xf32>
      %70 = vector.multi_reduction <add>, %69, %cst_40 [1] : vector<2x2xf32> to vector<2xf32>
      %71 = vector.shape_cast %70 : vector<2xf32> to vector<2x1xf32>
      %72 = math.log %71 : vector<2x1xf32>
      %73 = arith.addf %66, %72 : vector<2x1xf32>
      %74 = arith.mulf %64, %63 : vector<2x2xf32>
      %cst_41 = arith.constant dense<0.000000e+00> : vector<2xf32>
      %75 = vector.multi_reduction <add>, %74, %cst_41 [1] : vector<2x2xf32> to vector<2xf32>
      %76 = vector.shape_cast %75 : vector<2xf32> to vector<2x1xf32>
      %77 = arith.subf %73, %76 : vector<2x1xf32>
      %c0_42 = arith.constant 0 : index
      %c0_43 = arith.constant 0 : index
      %78 = vector.load %arg12[%c0_42, %c0_43] : memref<1x2xf32, #tpu.memory_space<vmem>>, vector<1x2xf32>
      %79 = vector.broadcast %78 : vector<1x2xf32> to vector<2x2xf32>
      %80 = arith.mulf %64, %79 : vector<2x2xf32>
      %cst_44 = arith.constant dense<0.000000e+00> : vector<2xf32>
      %81 = vector.multi_reduction <add>, %80, %cst_44 [1] : vector<2x2xf32> to vector<2xf32>
      %82 = vector.shape_cast %81 : vector<2xf32> to vector<2x1xf32>
      %83 = arith.mulf %82, %77 : vector<2x1xf32>
      %84 = vector.shape_cast %83 : vector<2x1xf32> to vector<1x2x1xf32>
      %cst_45 = arith.constant dense<0.000000e+00> : vector<1xf32>
      %85 = vector.multi_reduction <add>, %84, %cst_45 [1, 2] : vector<1x2x1xf32> to vector<1xf32>
      %86 = vector.shape_cast %85 : vector<1xf32> to vector<1x1x1xf32>
      %87 = vector.extract %86[0, 0, 0] : f32 from vector<1x1x1xf32>
      %88 = vector.shape_cast %82 : vector<2x1xf32> to vector<1x2x1xf32>
      %cst_46 = arith.constant dense<0.000000e+00> : vector<1xf32>
      %89 = vector.multi_reduction <add>, %88, %cst_46 [1, 2] : vector<1x2x1xf32> to vector<1xf32>
      %90 = vector.shape_cast %89 : vector<1xf32> to vector<1x1x1xf32>
      %91 = vector.extract %90[0, 0, 0] : f32 from vector<1x1x1xf32>
      %92 = arith.divf %87, %91 : f32
      %93 = tpu.iota {dimensions = array<i32: 0>} : vector<8x128xi32>
      %cst_47 = arith.constant 0.000000e+00 : f32
      %94 = vector.broadcast %cst_47 : f32 to vector<8x128xf32>
      %c0_i32_48 = arith.constant 0 : i32
      %95 = vector.broadcast %c0_i32_48 : i32 to vector<8x128xi32>
      %96 = arith.cmpi eq, %93, %95 : vector<8x128xi32>
      %97 = vector.broadcast %19 : f32 to vector<8x128xf32>
      %98 = arith.select %96, %97, %94 : vector<8x128xi1>, vector<8x128xf32>
      %c1_i32 = arith.constant 1 : i32
      %99 = vector.broadcast %c1_i32 : i32 to vector<8x128xi32>
      %100 = arith.cmpi eq, %93, %99 : vector<8x128xi32>
      %101 = vector.broadcast %41 : f32 to vector<8x128xf32>
      %102 = arith.select %100, %101, %98 : vector<8x128xi1>, vector<8x128xf32>
      %c2_i32 = arith.constant 2 : i32
      %103 = vector.broadcast %c2_i32 : i32 to vector<8x128xi32>
      %104 = arith.cmpi eq, %93, %103 : vector<8x128xi32>
      %105 = vector.broadcast %62 : f32 to vector<8x128xf32>
      %106 = arith.select %104, %105, %102 : vector<8x128xi1>, vector<8x128xf32>
      %c3_i32 = arith.constant 3 : i32
      %107 = vector.broadcast %c3_i32 : i32 to vector<8x128xi32>
      %108 = arith.cmpi eq, %93, %107 : vector<8x128xi32>
      %109 = vector.broadcast %92 : f32 to vector<8x128xf32>
      %110 = arith.select %108, %109, %106 : vector<8x128xi1>, vector<8x128xf32>
      %c0_49 = arith.constant 0 : index
      %c0_50 = arith.constant 0 : index
      %c0_51 = arith.constant 0 : index
      %111 = vector.load %arg13[%c0_49, %c0_50, %c0_51] : memref<1x8x128xf32, #tpu.memory_space<vmem>>, vector<1x8x128xf32>
      %112 = vector.shape_cast %111 : vector<1x8x128xf32> to vector<8x128xf32>
      %113 = vector.shape_cast %110 : vector<8x128xf32> to vector<1x8x128xf32>
      tpu.vector_store %arg13[%c0_49, %c0_50, %c0_51], %113 {strides = array<i32>} : memref<1x8x128xf32, #tpu.memory_space<vmem>>, vector<1x8x128xf32>,
    } else {
    }
    return
  }
  func.func @transform_0(%arg0: i32, %arg1: i32) -> (i32, i32) {
    %c1_i32 = arith.constant 1 : i32
    %0 = arith.muli %arg0, %c1_i32 : i32
    %1 = arith.addi %0, %arg1 : i32
    %c0_i32 = arith.constant 0 : i32
    %2 = arith.minsi %1, %c0_i32 : i32
    %c0_i32_0 = arith.constant 0 : i32
    %c0_i32_1 = arith.constant 0 : i32
    return %2, %c0_i32_0 : i32, i32
  }
  func.func @transform_1(%arg0: i32, %arg1: i32) -> (i32, i32) {
    %c1_i32 = arith.constant 1 : i32
    %0 = arith.muli %arg0, %c1_i32 : i32
    %1 = arith.addi %0, %arg1 : i32
    %c0_i32 = arith.constant 0 : i32
    %2 = arith.minsi %1, %c0_i32 : i32
    %c0_i32_0 = arith.constant 0 : i32
    %c0_i32_1 = arith.constant 0 : i32
    return %2, %c0_i32_0 : i32, i32
  }
  func.func @transform_2(%arg0: i32, %arg1: i32) -> (i32, i32) {
    %c0_i32 = arith.constant 0 : i32
    %c0_i32_0 = arith.constant 0 : i32
    %c0_i32_1 = arith.constant 0 : i32
    return %c0_i32, %c0_i32_0 : i32, i32
  }
  func.func @transform_3(%arg0: i32, %arg1: i32) -> (i32, i32) {
    %c0_i32 = arith.constant 0 : i32
    %c0_i32_0 = arith.constant 0 : i32
    %c0_i32_1 = arith.constant 0 : i32
    return %c0_i32, %c0_i32_0 : i32, i32
  }
  func.func @transform_4(%arg0: i32, %arg1: i32) -> (i32, i32) {
    %c0_i32 = arith.constant 0 : i32
    %c0_i32_0 = arith.constant 0 : i32
    %c0_i32_1 = arith.constant 0 : i32
    return %c0_i32, %c0_i32_0 : i32, i32
  }
  func.func @transform_5(%arg0: i32, %arg1: i32) -> (i32, i32) {
    %c0_i32 = arith.constant 0 : i32
    %c0_i32_0 = arith.constant 0 : i32
    %c0_i32_1 = arith.constant 0 : i32
    return %c0_i32, %c0_i32_0 : i32, i32
  }
  func.func @transform_6(%arg0: i32, %arg1: i32) -> (i32, i32) {
    %c0_i32 = arith.constant 0 : i32
    %c0_i32_0 = arith.constant 0 : i32
    %c0_i32_1 = arith.constant 0 : i32
    return %c0_i32, %c0_i32_0 : i32, i32
  }
  func.func @transform_7(%arg0: i32, %arg1: i32) -> (i32, i32) {
    %c0_i32 = arith.constant 0 : i32
    %c0_i32_0 = arith.constant 0 : i32
    %c0_i32_1 = arith.constant 0 : i32
    return %c0_i32, %c0_i32_0 : i32, i32
  }
  func.func @transform_8(%arg0: i32, %arg1: i32) -> (i32, i32) {
    %c0_i32 = arith.constant 0 : i32
    %c0_i32_0 = arith.constant 0 : i32
    %c0_i32_1 = arith.constant 0 : i32
    return %c0_i32, %c0_i32_0 : i32, i32
  }
  func.func @transform_9(%arg0: i32, %arg1: i32) -> (i32, i32) {
    %c0_i32 = arith.constant 0 : i32
    %c0_i32_0 = arith.constant 0 : i32
    %c0_i32_1 = arith.constant 0 : i32
    return %c0_i32, %c0_i32_0 : i32, i32
  }
  func.func @transform_10(%arg0: i32, %arg1: i32) -> (i32, i32) {
    %c0_i32 = arith.constant 0 : i32
    %c0_i32_0 = arith.constant 0 : i32
    %c0_i32_1 = arith.constant 0 : i32
    return %c0_i32, %c0_i32_0 : i32, i32
  }
  func.func @transform_11(%arg0: i32, %arg1: i32) -> (i32, i32, i32) {
    %c0_i32 = arith.constant 0 : i32
    %c0_i32_0 = arith.constant 0 : i32
    %c0_i32_1 = arith.constant 0 : i32
    return %arg0, %c0_i32, %c0_i32_0 : i32, i32, i32
  }
}

</mosaic_0001>

<bundles_post_ra>
// kernel: tpu_custom_call.1
= control target key start
LH: loop header
LB: loop body
LE: loop exit
PB: predicated region body
PF: predicated region fallthrough
CT: control target
= control target key end

     0   :  { %16 = vsyncpa [#allocation4], 0  ;;  %s636_s0 = inlined_call_operand.hbm [shape: f32[4,512], index: 0, kind: input, shape index: {}]   ;;  %s637_s1 = inlined_call_operand.hbm [shape: f32[4,512], index: 1, kind: input, shape index: {}]   ;;  %s638_s2 = inlined_call_operand.vmem [shape: f32[2,32], index: 2, kind: input, shape index: {}]   ;;  %s639_s3 = inlined_call_operand.vmem [shape: f32[2,32], index: 3, kind: input, shape index: {}]   ;;  %s640_s4 = inlined_call_operand.vmem [shape: f32[2,32], index: 4, kind: input, shape index: {}]   ;;  %s641_s5 = inlined_call_operand.vmem [shape: f32[2,8], index: 5, kind: input, shape index: {}]   ;;  %s642_s6 = inlined_call_operand.vmem [shape: f32[2,8], index: 6, kind: input, shape index: {}]   ;;  %s643_s7 = inlined_call_operand.hbm [shape: f32[1,8], index: 7, kind: input, shape index: {}]   ;;  %s644_s8 = inlined_call_operand.vmem [shape: f32[2,2], index: 8, kind: input, shape index: {}]   ;;  %s645_s9 = inlined_call_operand.vmem [shape: f32[2,2], index: 9, kind: input, shape index: {}]   ;;  %s646_s10 = inlined_call_operand.vmem [shape: f32[1,2], index: 10, kind: input, shape index: {}]   ;;  %s647_s11 = inlined_call_operand.hbm [shape: f32[1,8,128], index: 11, kind: output, shape index: {}]  }
   0x1   :  { %17 = vsyncpa [#allocation7], 0 }
   0x2   :  { %18 = vsyncpa [#allocation5], 0  ;;  %s495_s17 = smov [#allocation6]   ;;  %s496_s19 = smov [#allocation3]  }
   0x3   :  { %s47_s18 = sshll.u32 %s495_s17, 4  ;;  %s31_s20 = sshll.u32 %s496_s19, 4  ;;  %s48_s18 = int_to_ptr.vmem [resolvable:$true] %s47_s18  ;;  %s32_s20 = int_to_ptr.vmem [resolvable:$true] %s31_s20 }
   0x4   :  { %s417_s21 = scalar_lea.vmem %s48_s18, 256  ;;  %p422_p1 = scmp.lt.s32.totalorder %s48_s18, %s48_s18 }
   0x5   :  { %p418_p0 = scmp.ne.s32.totalorder %s48_s18, %s417_s21  ;;  %p423_p2 = scmp.lt.s32.totalorder %s417_s21, %s417_s21 }
   0x7   :  { %p424_p3 = por %p423_p2, %p422_p1 }
   0x9   :  { %p425_p4 = pnand %p424_p3, %p418_p0 }
   0xb   :  { %428 = shalt.err (!%p425_p4)
}
   0xc   :  { %50 = dma.hbm_to_vmem [thread:$0]  %s637_s1, 256, %s48_s18, [#allocation7]  }
   0xd   :  { %s437_s24 = scalar_lea.vmem %s32_s20, 256  ;;  %p442_p6 = scmp.lt.s32.totalorder %s32_s20, %s32_s20 }
   0xe   :  { %p438_p5 = scmp.ne.s32.totalorder %s32_s20, %s437_s24  ;;  %p443_p7 = scmp.lt.s32.totalorder %s437_s24, %s437_s24 }
  0x10   :  { %p444_p8 = por %p443_p7, %p442_p6 }
  0x12   :  { %p445_p9 = pnand %p444_p8, %p438_p5 }
  0x14   :  { %448 = shalt.err (!%p445_p9)
}
  0x15   :  { %34 = dma.hbm_to_vmem [thread:$0]  %s636_s0, 256, %s32_s20, [#allocation4]  }
  0x16   :  { %s497_s27 = smov [#allocation8]  }
  0x17   :  { %s67_s28 = sshll.u32 %s497_s27, 4  ;;  %s68_s28 = int_to_ptr.vmem [resolvable:$true] %s67_s28 }
  0x18   :  { %s457_s29 = scalar_lea.vmem %s68_s28, 16  ;;  %s461_s30 = scalar_lea.vmem %s68_s28, 32 }
  0x19   :  { %p458_p10 = scmp.ne.s32.totalorder %s68_s28, %s457_s29  ;;  %p462_p11 = scmp.lt.s32.totalorder %s68_s28, %s68_s28 }
  0x1a   :  { %p463_p12 = scmp.lt.s32.totalorder %s461_s30, %s457_s29 }
  0x1c   :  { %p464_p13 = por %p463_p12, %p462_p11 }
  0x1e   :  { %p465_p0 = pnand %p464_p13, %p458_p10 }
  0x20   :  { %468 = shalt.err (!%p465_p0)
}
  0x21   :  { %70 = dma.hbm_to_vmem [thread:$0]  %s643_s7, 16, %s68_s28, [#allocation7]  }
  0x22   :  { %489 = dma.done.wait [#allocation4], 256  }
  0x23   :  { %490 = vsyncadd [#allocation4], 4294967040 }
  0x24   :  { %491 = dma.done.wait [#allocation7], 272  }
  0x25   :  { %492 = vsyncadd [#allocation7], 4294967024  ;;  %vm287_vm0 = vcmask 9216   ;;  %v285_v0 = vld [vmem:[%s644_s8] sm:$0x3]  ;;  %vm232_vm1 = vcmask 254976   ;;  %v96_v53 = vlaneseq }
  0x26   :  { %v288_v1 = vsel %vm287_vm0, %v285_v0, -inf  ;;  %v222_v2 = vld [vmem:[%s639_s3] sm:$0x3]  ;;  %v101_v16 = vld [vmem:[#allocation3] sm:$0xff]  ;;  %v102_v17 = vld [vmem:[#allocation3 + $0x8] sm:$0xff]  ;;  %vm116_vm2 = vcmask 1043456  }
  0x27   :  { %289 = vmax.xlane.f32.xlu0 %v288_v1  ;;  %v229_v3 = vmul.f32 1.442695, %v222_v2  ;;  %v223_v4 = vld [vmem:[%s638_s2] sm:$0x3]  ;;  %v226_v7 = vadd.f32 1.0, %v222_v2  ;;  %v103_v18 = vld [vmem:[#allocation6] sm:$0xff] }
  0x28   :  { %v224_v5 = vld [vmem:[%s640_s4] sm:$0x3]  ;;  %v105_v20 = vsub.f32 %v101_v16, %v103_v18  ;;  %v498_v58 = vmov 1966171168   ;;  %v599_v63 = vshrl.u32 %v96_v53, 7  ;;  %vm601_vm3 = vcmp.lt.s32.totalorder %v96_v53, 512 }
  0x29   :  { %397 = vpow2.f32 %v229_v3  ;;  %v225_v6 = vsub.f32 %v223_v4, %v224_v5  ;;  %v586_v13 = vld [vmem:[%s645_s9] sm:$0x3]  ;;  %v152_v59 = vunpack.c.l.s4 %v498_v58  ;;  %v499_v3 = vmov 0.0   ;;  %s500_s26 = smov [#allocation9]  }
  0x2a   :  { %v300_v14 = vmul.f32 %v586_v13, %v285_v0  ;;  %v104_v19 = vld [vmem:[#allocation6 + $0x8] sm:$0xff]  ;;  %v107_v22 = vmul.f32 %v105_v20, %v105_v20  ;;  %100 = vst.msk [vmem:[#allocation2] sm:$0xf] %vm601_vm3, %v499_v3  ;;  %vm205_vm4 = vcmask 1040384   ;;  %vm239_vm5 = vcmask 1024   ;;  %s362_s27 = sshll.u32 %s500_s26, 4  ;;  %s363_s27 = int_to_ptr.vmem [resolvable:$true] %s362_s27 }
  0x2b   :  { %v227_v8 = vmul.f32 %v225_v6, %v225_v6  ;;  %v106_v21 = vsub.f32 %v102_v17, %v104_v19  ;;  %v593_v29 = vld [vmem:[%s641_s5] sm:$0x3]  ;;  %v153_v2 = vunpack.c.0.s8 %v152_v59  ;;  %vm274_vm6 = vcmask 58368   ;;  %s469_s29 = scalar_lea.vmem %s363_s27, 128  ;;  %p474_p2 = scmp.lt.s32.totalorder %s363_s27, %s363_s27 }
  0x2c   :  { %v301_v15 = vsel %vm287_vm0, %v300_v14, 0.0  ;;  %v112_v24 = vcombine.high %v107_v22, %v107_v22  ;;  %v117_v26 = vsel %vm116_vm2, %v107_v22, 0.0  ;;  %v258_v35 = vand.u32 2147483647, %v593_v29  ;;  %p470_p1 = scmp.ne.s32.totalorder %s363_s27, %s469_s29  ;;  %p475_p3 = scmp.lt.s32.totalorder %s469_s29, %s469_s29 }
  0x2d   :  { %v228_v9 = vsub.f32 %v226_v7, %v227_v8  ;;  %v108_v23 = vmul.f32 %v106_v21, %v106_v21  ;;  %v118_v30 = vrot.slane %v117_v26, 4  ;;  %v156_v6 = vsub.s32 %v153_v2, %v599_v63 }
  0x2e   :  { %v124_v27 = vsel %vm116_vm2, %v112_v24, 0.0  ;;  %v259_v42 = vsub.f32 0.0, %v258_v35  ;;  %v187_v21 = vsub.s32 0, %v599_v63  ;;  %vm343_vm7 = vcmp.eq.s32.totalorder %v599_v63, 0  ;;  %p476_p4 = por %p475_p3, %p474_p2 }
  0x2f   :  { %v113_v25 = vcombine.high %v108_v23, %v108_v23  ;;  %v131_v28 = vsel %vm116_vm2, %v108_v23, 0.0  ;;  %v125_v31 = vrot.slane %v124_v27, 4  ;;  %v119_v37 = vadd.f32 %v118_v30, %v117_v26 }
  0x30   :  { %v132_v32 = vrot.slane %v131_v28, 4  ;;  %v260_v48 = vmul.f32 1.442695, %v259_v42  ;;  %v195_v23 = vsub.s32 2, %v599_v63  ;;  %vm346_vm8 = vcmp.eq.s32.totalorder %v599_v63, 1  ;;  %p477_p5 = pnand %p476_p4, %p470_p1 }
  0x31   :  { %v138_v33 = vsel %vm116_vm2, %v113_v25, 0.0  ;;  %v126_v38 = vadd.f32 %v125_v31, %v124_v27  ;;  %v120_v43 = vrot.slane %v119_v37, 2  ;;  %vm349_vm9 = vcmp.eq.s32.totalorder %v599_v63, 2 }
  0x32   :  { %v139_v34 = vrot.slane %v138_v33, 4  ;;  %v133_v39 = vadd.f32 %v132_v32, %v131_v28  ;;  %v199_v28 = vsub.s32 3, %v599_v63  ;;  %vm352_vm10 = vcmp.eq.s32.totalorder %v599_v63, 3 }
  0x33   :  { %v127_v44 = vrot.slane %v126_v38, 2  ;;  %v121_v49 = vadd.f32 %v120_v43, %v119_v37 }
  0x34   :  { %v140_v41 = vadd.f32 %v139_v34, %v138_v33  ;;  %v134_v45 = vrot.slane %v133_v39, 2  ;;  %v254_v33 = vld [vmem:[%s642_s6] sm:$0x3] }
  0x35   :  { %v128_v50 = vadd.f32 %v127_v44, %v126_v38  ;;  %v122_v54 = vrot.slane %v121_v49, 1  ;;  %v255_v38 = vmax.f32 %v593_v29, 0.0 }
  0x36   :  { %v398_v10 = vpop.eup %397  ;;  %v141_v47 = vrot.slane %v140_v41, 2  ;;  %v135_v51 = vadd.f32 %v134_v45, %v133_v39 }
  0x37   :  { %v231_v11 = vsub.f32 %v228_v9, %v398_v10  ;;  %v129_v55 = vrot.slane %v128_v50, 1  ;;  %v123_v60 = vadd.f32 %v122_v54, %v121_v49  ;;  %v378_v9 = vld [vmem:[%s646_s10] ss:$0 sm:$0xff]  ;;  %v377_v49 = vld [vmem:[#allocation8] ss:$0 sm:$0xff] }
  0x38   :  { %v142_v52 = vadd.f32 %v141_v47, %v140_v41  ;;  %v136_v56 = vrot.slane %v135_v51, 1 }
  0x39   :  { %v233_v12 = vsel %vm232_vm1, %v231_v11, 0.0  ;;  %v130_v61 = vadd.f32 %v129_v55, %v128_v50  ;;  %v312_v11 = vmul.f32 %v378_v9, %v586_v13  ;;  %v191_v13 = vsub.s32 1, %v599_v63 }
  0x3a   :  { %234 = vadd.xlane.f32.xlu1 %v233_v12  ;;  %v143_v57 = vrot.slane %v142_v52, 1  ;;  %v137_v62 = vadd.f32 %v136_v56, %v135_v51  ;;  %v109_v12 = vld [vmem:[#allocation2] sm:$0xf] }
  0x3b   :  { %v149_v4 = vcombine.low %v123_v60, %v130_v61  ;;  %v313_v19 = vsel %vm287_vm0, %v312_v11, 0.0 }
  0x3c   :  { %v144_v1 = vadd.f32 %v143_v57, %v142_v52 }
  0x3d   :  { %v157_v7 = vrot.slane %v149_v4, %v156_v6 }
  0x3e   :  { %302 = vadd.xlane.f32.xlu1 %v301_v15  ;;  %v150_v5 = vcombine.low %v137_v62, %v144_v1 }
  0x40   :  { %v164_v8 = vrot.slane %v150_v5, %v156_v6 }
  0x42   :  { %v165_v10 = vcombine.low %v157_v7, %v164_v8 }
  0x44   :  { %v172_v14 = vrot.slane %v165_v10, %v156_v6 }
  0x46   :  { %v174_v17 = vadd.f32 %v172_v14, %v109_v12 }
  0x48   :  { %179 = vst.msk [vmem:[#allocation2] sm:$0xf] %vm601_vm3, %v174_v17 }
  0x4f   :  { %v183_v22 = vld [vmem:[#allocation2] sm:$0xf] }
  0x50   :  { %v188_v24 = vrot.slane %v183_v22, %v187_v21  ;;  %v192_v25 = vrot.slane %v183_v22, %v191_v13  ;;  %v196_v27 = vrot.slane %v183_v22, %v195_v23  ;;  %v200_v34 = vrot.slane %v183_v22, %v199_v28 }
  0x52   :  { %v206_v31 = vsel %vm205_vm4, %v188_v24, 0.0  ;;  %v207_v32 = vsel %vm205_vm4, %v192_v25, 0.0  ;;  %v209_v37 = vsel %vm205_vm4, %v196_v27, 0.0  ;;  %v211_v42 = vsel %vm205_vm4, %v200_v34, 0.0 }
  0x53   :  { %v208_v35 = vadd.f32 %v207_v32, %v206_v31 }
  0x55   :  { %v210_v41 = vadd.f32 %v209_v37, %v208_v35 }
  0xb0   :  { %v596_v36 = vpop.xlane.xlu0 %289 }
  0xb1   :  { %v291_v40 = vsub.f32 %v285_v0, %v596_v36 }
  0xb3   :  { %v292_v46 = vmul.f32 1.442695, %v291_v40  ;;  %v256_v40 = vmul.f32 %v254_v33, %v593_v29 }
  0xb5   :  { %399 = vpow2.f32 %v292_v46  ;;  %v257_v44 = vsub.f32 %v255_v38, %v256_v40  ;;  %v212_v46 = vadd.f32 %v211_v42, %v210_v41 }
  0xb6   :  { %401 = vpow2.f32 %v260_v48 }
  0xb7   :  { %213 = vadd.xlane.f32.xlu1 %v212_v46 }
  0xc2   :  { %v400_v15 = vpop.eup %399 }
  0xc3   :  { %v294_v16 = vsel %vm287_vm0, %v400_v15, 0.0  ;;  %v402_v18 = vpop.eup %401  ;;  %v235_v26 = vpop.xlane.xlu1 %234 }
  0xc4   :  { %295 = vadd.xlane.f32.xlu0 %v294_v16  ;;  %v262_v20 = vadd.f32 1.0, %v402_v18  ;;  %v236_v30 = vmul.f32 -0.5, %v235_v26 }
  0xc6   :  { %403 = vlog2.f32 %v262_v20  ;;  %v376_v39 = vadd.f32 -0.5, %v236_v30 }
  0xc7   :  { %v303_v56 = vpop.xlane.xlu1 %302 }
  0xc8   :  { %314 = vadd.xlane.f32.xlu0 %v313_v19  ;;  %v238_v43 = vand.u32 2147483647, %v376_v39 }
  0xca   :  { %v240_v47 = vsel %vm239_vm5, %v238_v43, 0.0 }
  0xcc   :  { %241 = vadd.xlane.f32.xlu0 %v240_v47 }
  0xd3   :  { %v404_v45 = vpop.eup %403 }
  0xd4   :  { %v264_v48 = vmul.f32 0.6931472, %v404_v45 }
  0xd6   :  { %v265_v50 = vadd.f32 %v264_v48, %v257_v44 }
  0xd8   :  { %v273_v51 = vmul.f32 %v377_v49, %v265_v50 }
  0xda   :  { %v275_v52 = vsel %vm274_vm6, %v273_v51, 0.0 }
  0xdb   :  { %276 = vadd.xlane.f32.xlu1 %v275_v52 }
 0x140   :  { %v214_v59 = vpop.xlane.xlu1 %213 }
 0x141   :  { %v215_v62 = vrot.slane %v214_v59, 4 }
 0x143   :  { %v216_v2 = vadd.f32 %v215_v62, %v214_v59 }
 0x145   :  { %v217_v5 = vrot.slane %v216_v2, 2 }
 0x147   :  { %v218_v9 = vadd.f32 %v217_v5, %v216_v2 }
 0x149   :  { %v219_v12 = vrot.slane %v218_v9, 1 }
 0x14b   :  { %v220_v15 = vadd.f32 %v219_v12, %v218_v9 }
 0x14d   :  { %v296_v53 = vpop.xlane.xlu0 %295  ;;  %379 = vpush %v220_v15 }
 0x14e   :  { %405 = vlog2.f32 %v296_v53 }
 0x151   :  { %v315_v29 = vpop.xlane.xlu0 %314 }
 0x152   :  { %v327_v54 = vsel %vm239_vm5, %v315_v29, 0.0 }
 0x153   :  { %328 = vadd.xlane.f32.xlu1 %v327_v54 }
 0x155   :  { %v242_v60 = vpop.xlane.xlu0 %241 }
 0x156   :  { %v243_v0 = vrot.slane %v242_v60, 4 }
 0x158   :  { %v244_v3 = vadd.f32 %v243_v0, %v242_v60 }
 0x15a   :  { %v245_v6 = vrot.slane %v244_v3, 2 }
 0x15b   :  { %v406_v55 = vpop.eup %405 }
 0x15c   :  { %v298_v57 = vmul.f32 0.6931472, %v406_v55  ;;  %v246_v10 = vadd.f32 %v245_v6, %v244_v3 }
 0x15e   :  { %v299_v58 = vadd.f32 %v298_v57, %v596_v36  ;;  %v247_v36 = vrot.slane %v246_v10, 1 }
 0x160   :  { %v304_v61 = vsub.f32 %v299_v58, %v303_v56  ;;  %v248_v16 = vadd.f32 %v247_v36, %v246_v10 }
 0x162   :  { %v316_v1 = vmul.f32 %v315_v29, %v304_v61  ;;  %381 = vpush %v248_v16 }
 0x164   :  { %v317_v4 = vsel %vm239_vm5, %v316_v1, 0.0  ;;  %v277_v7 = vpop.xlane.xlu1 %276 }
 0x165   :  { %318 = vadd.xlane.f32.xlu0 %v317_v4  ;;  %v278_v8 = vrot.slane %v277_v7, 4 }
 0x167   :  { %v279_v11 = vadd.f32 %v278_v8, %v277_v7 }
 0x169   :  { %v280_v14 = vrot.slane %v279_v11, 2 }
 0x16b   :  { %v281_v17 = vadd.f32 %v280_v14, %v279_v11 }
 0x16d   :  { %v282_v18 = vrot.slane %v281_v17, 1 }
 0x16f   :  { %v283_v19 = vadd.f32 %v282_v18, %v281_v17 }
 0x171   :  { %383 = vpush %v283_v19 }
 0x17e   :  { %s380_s6 = spop %379 }
 0x17f   :  { %v344_v37 = vstv %s380_s6 }
 0x180   :  { %v345_v38 = vsel %vm343_vm7, %v344_v37, 0.0 }
 0x193   :  { %s382_s20 = spop %381 }
 0x194   :  { %s252_s24 = smul.f32 0.5, %s382_s20 }
 0x196   :  { %v347_v39 = vstv %s252_s24 }
 0x197   :  { %v348_v40 = vsel %vm346_vm8, %v347_v39, %v345_v38 }
 0x1a2   :  { %s384_s21 = spop %383 }
 0x1a3   :  { %v350_v41 = vstv %s384_s21 }
 0x1a4   :  { %v351_v42 = vsel %vm349_vm9, %v350_v41, %v348_v40 }
 0x1dc   :  { %v329_v20 = vpop.xlane.xlu1 %328 }
 0x1dd   :  { %v330_v21 = vrot.slane %v329_v20, 4 }
 0x1df   :  { %v331_v13 = vadd.f32 %v330_v21, %v329_v20 }
 0x1e1   :  { %v332_v22 = vrot.slane %v331_v13, 2 }
 0x1e3   :  { %v333_v26 = vadd.f32 %v332_v22, %v331_v13 }
 0x1e5   :  { %v334_v30 = vrot.slane %v333_v26, 1 }
 0x1e7   :  { %v335_v33 = vadd.f32 %v334_v30, %v333_v26 }
 0x1ee   :  { %v319_v23 = vpop.xlane.xlu0 %318 }
 0x1ef   :  { %v320_v24 = vrot.slane %v319_v23, 4 }
 0x1f1   :  { %v321_v25 = vadd.f32 %v320_v24, %v319_v23 }
 0x1f3   :  { %v322_v27 = vrot.slane %v321_v25, 2 }
 0x1f5   :  { %v323_v28 = vadd.f32 %v322_v27, %v321_v25 }
 0x1f7   :  { %v324_v31 = vrot.slane %v323_v28, 1 }
 0x1f9   :  { %v325_v32 = vadd.f32 %v324_v31, %v323_v28 }
 0x1fb   :  { %385 = vpush %v325_v32 }
 0x1fc   :  { %387 = vpush %v335_v33 }
 0x22c   :  { %s386_s22 = spop %385 }
 0x22d   :  { %s388_s23 = spop %387 }
 0x22e   :  { %v337_v34 = vstv %s388_s23 }
 0x22f   :  { %407 = vrcp.f32 %v337_v34 }
 0x23c   :  { %v408_v35 = vpop.eup %407 }
 0x23d   :  { %389 = vpush %v408_v35 }
 0x26e   :  { %s390_s25 = spop %389 }
 0x26f   :  { %s340_s28 = smul.f32 %s390_s25, %s386_s22 }
 0x271   :  { %v353_v43 = vstv %s340_s28 }
 0x272   :  { %v354_v44 = vsel %vm352_vm10, %v353_v43, %v351_v42 }
 0x273   :  { %355 = vst [vmem:[#allocation9] sm:$0xff] %v354_v44 }
 0x274   :  { %480 = shalt.err (!%p477_p5)
}
 0x275   :  { %365 = dma.vmem_to_hbm [thread:$0]  %s363_s27, 128, %s647_s11, [#allocation5]  }
 0x276   :  { %493 = dma.done.wait [#allocation5], 128  }
 0x277   :  { %494 = vsyncadd [#allocation5], 4294967168 }
 0x278   :  { %369 = vsyncpa [#allocation4], 1 }
 0x279   :  { %370 = vsyncpa [#allocation7], 1 }
 0x27a   :  { %371 = vsyncpa [#allocation5], 1 }

</bundles_post_ra>
